<compile_context>
chip_gen: v7x
topology: tpu7x:2x2x1
jax: 0.10.0
libtpu: 0.0.40
codegen_flags: <defaults>
</compile_context>

<pallas_src>
import jax
import jax.numpy as jnp
import numpy as np
from jax.experimental import pallas as pl
from jax.experimental.pallas import tpu as pltpu


def _round_up(x, m):
    return ((x + m - 1) // m) * m


def ffn_fused_kernel(x_ref, w1_ref, t1_ref, w2_ref, b2_ref, o_ref):
    """Fused conv1x1 (all heads) + folded BN + ReLU + block-diagonal conv1x1.

    x_ref : (tm, Cin)       rows of the flattened [B*L, Cin] input
    w1_ref: (Cin, Htot)     concatenated first-conv weights, BN scale folded in
    t1_ref: (1, Htot)       folded additive term: b1*s + beta - mean*s
    w2_ref: (Htot, ClsP)    block-diagonal final-conv weight (lane-padded)
    b2_ref: (1, ClsP)       concatenated final-conv bias (lane-padded)
    o_ref : (tm, ClsP)
    """
    x = x_ref[...]
    h = jnp.dot(x, w1_ref[...], preferred_element_type=jnp.float32)
    h = jnp.maximum(h + t1_ref[...], 0.0)               # bias+BN folded, ReLU
    o = jnp.dot(h, w2_ref[...], preferred_element_type=jnp.float32) + b2_ref[...]
    o_ref[...] = o.astype(o_ref.dtype)


def run_ffn_fused(x_cl, w1c, t1c, w2bd, b2c, *, tm=2048):
    """x_cl: [N, Cin] channels-last flattened input.  Returns [N, ClsP] f32."""
    N, Cin = x_cl.shape
    Htot = w1c.shape[1]
    ClsP = w2bd.shape[1]

    # Large row tiles; clamp to the (8-rounded) problem size and pad the tail.
    tm_eff = max(8, min(tm, _round_up(N, 8)))
    N_pad = _round_up(N, tm_eff)
    if N_pad != N:
        x_cl = jnp.pad(x_cl, ((0, N_pad - N), (0, 0)))

    out = pl.pallas_call(
        ffn_fused_kernel,
        out_shape=jax.ShapeDtypeStruct((N_pad, ClsP), jnp.float32),
        grid_spec=pltpu.PrefetchScalarGridSpec(
            num_scalar_prefetch=0,
            grid=(N_pad // tm_eff,),
            in_specs=[
                pl.BlockSpec((tm_eff, Cin), lambda i: (i, 0)),
                pl.BlockSpec((Cin, Htot), lambda i: (0, 0)),
                pl.BlockSpec((1, Htot), lambda i: (0, 0)),
                pl.BlockSpec((Htot, ClsP), lambda i: (0, 0)),
                pl.BlockSpec((1, ClsP), lambda i: (0, 0)),
            ],
            out_specs=pl.BlockSpec((tm_eff, ClsP), lambda i: (i, 0)),
        ),
        compiler_params=pltpu.CompilerParams(
            dimension_semantics=("parallel",)),
    )(x_cl, w1c, t1c, w2bd, b2c)
    return out[:N]


def build_fused_params(params, eps=1e-5):
    """Fold BN into W1/t1, concatenate heads, build block-diagonal W2 (glue)."""
    heads = list(params.keys())
    w1_cols, t1_cols, cls_list = [], [], []
    H = None
    for head in heads:
        p = params[head]
        _, H = p['w1'].shape
        scale = p['gamma'] / jnp.sqrt(p['var'] + eps)
        w1_cols.append(p['w1'] * scale[None, :])                 # fold BN scale
        t1_cols.append(p['b1'] * scale + p['beta'] - p['mean'] * scale)
        cls_list.append(p['w2'].shape[1])

    n_heads = len(heads)
    Htot = H * n_heads
    cls_total = sum(cls_list)
    ClsP = _round_up(cls_total, 128)                             # lane-dense out

    w1c = jnp.concatenate(w1_cols, axis=1).astype(jnp.float32)   # [Cin, Htot]
    t1c = jnp.concatenate(t1_cols).reshape(1, Htot).astype(jnp.float32)

    w2bd = jnp.zeros((Htot, ClsP), jnp.float32)
    b2c = jnp.zeros((ClsP,), jnp.float32)
    offsets = {}
    off = 0
    for idx, head in enumerate(heads):
        p = params[head]
        cls = p['w2'].shape[1]
        w2bd = w2bd.at[idx * H:(idx + 1) * H, off:off + cls].set(
            p['w2'].astype(jnp.float32))
        b2c = b2c.at[off:off + cls].set(p['b2'].astype(jnp.float32))
        offsets[head] = (off, cls)
        off += cls

    return dict(w1c=w1c, t1c=t1c, w2bd=w2bd, b2c=b2c.reshape(1, ClsP),
                offsets=offsets)


def init_ffn_params(key, in_channels, heads, head_conv, init_bias=-2.19):
    """Deterministic synthetic parameters mirroring the PyTorch module shapes.

    Conv1d weight [out, in, 1] is stored channels-last as [in, out].
    BatchNorm1d running stats are as freshly constructed (mean=0, var=1), with
    small random gamma/beta perturbations so the BN path is exercised.
    """
    params = {}
    for head, (classes, num_conv) in heads.items():
        assert num_conv == 2, "fused kernel implements the standard 2-conv head"
        key, k1, k2, k3, k4, k5 = jax.random.split(key, 6)
        w1 = jax.random.normal(k1, (in_channels, head_conv), jnp.float32) * 0.05
        b1 = jax.random.normal(k2, (head_conv,), jnp.float32) * 0.01
        gamma = 1.0 + 0.1 * jax.random.normal(k3, (head_conv,), jnp.float32)
        beta = 0.1 * jax.random.normal(k4, (head_conv,), jnp.float32)
        mean = jnp.zeros((head_conv,), jnp.float32)
        var = jnp.ones((head_conv,), jnp.float32)
        w2 = jax.random.normal(k5, (head_conv, classes), jnp.float32) * 0.05
        if head == 'heatmap':
            b2 = jnp.full((classes,), init_bias, jnp.float32)    # init_weights()
        else:
            b2 = jnp.zeros((classes,), jnp.float32)
        params[head] = dict(w1=w1, b1=b1, gamma=gamma, beta=beta,
                            mean=mean, var=var, w2=w2, b2=b2)
    return params


def ffn_forward(x_ncl, params, *, tm=2048, eps=1e-5):
    """x_ncl: [B, C, L] (PyTorch NCL layout).  Returns dict of [B, classes, L]."""
    B, C, L = x_ncl.shape
    x_cl = jnp.transpose(x_ncl, (0, 2, 1)).reshape(B * L, C)     # layout glue
    fused = build_fused_params(params, eps=eps)
    y = run_ffn_fused(x_cl, fused['w1c'], fused['t1c'],
                      fused['w2bd'], fused['b2c'], tm=tm)
    out = {}
    for head, (off, cls) in fused['offsets'].items():
        yh = y[:, off:off + cls]
        out[head] = jnp.transpose(yh.reshape(B, L, cls), (0, 2, 1))
    return out


def ffn_reference(x_ncl, params, eps=1e-5):
    """Pure-JAX reference (same math as the PyTorch module) for checking."""
    B, C, L = x_ncl.shape
    x_cl = jnp.transpose(x_ncl, (0, 2, 1)).reshape(B * L, C)
    out = {}
    for head, p in params.items():
        h = x_cl @ p['w1'] + p['b1']
        h = (h - p['mean']) / jnp.sqrt(p['var'] + eps) * p['gamma'] + p['beta']
        h = jnp.maximum(h, 0.0)
        y = h @ p['w2'] + p['b2']
        cls = p['w2'].shape[1]
        out[head] = jnp.transpose(y.reshape(B, L, cls), (0, 2, 1))
    return out


if __name__ == "__main__":
    # Small shapes consistent with the module: x is [B, in_channels, L] for Conv1d.
    B, C_IN, L = 2, 32, 128
    HEAD_CONV = 32
    HEADS = {'reg': (2, 2), 'height': (1, 2), 'dim': (3, 2),
             'rot': (2, 2), 'vel': (2, 2), 'heatmap': (1, 2)}

    key = jax.random.PRNGKey(0)
    kx, kp = jax.random.split(key)
    x = jax.random.normal(kx, (B, C_IN, L), jnp.float32)
    params = init_ffn_params(kp, C_IN, HEADS, HEAD_CONV)

    out = ffn_forward(x, params)
    out = jax.tree_util.tree_map(jax.block_until_ready, out)

    ref = ffn_reference(x, params)
    for head in HEADS:
        classes, _ = HEADS[head]
        assert out[head].shape == (B, classes, L), (head, out[head].shape)
        np.testing.assert_allclose(np.asarray(out[head]), np.asarray(ref[head]),
                                   rtol=1e-5, atol=1e-5)

    print("KERNEL_OK")
</pallas_src>

<mosaic_0001>
module attributes {stable_mosaic.version = 11 : i64} {
  func.func @ffn_fused_kernel(%arg0: i32, %arg1: memref<256x32xf32, #tpu.memory_space<vmem>>, %arg2: memref<32x192xf32, #tpu.memory_space<vmem>>, %arg3: memref<1x192xf32, #tpu.memory_space<vmem>>, %arg4: memref<192x128xf32, #tpu.memory_space<vmem>>, %arg5: memref<1x128xf32, #tpu.memory_space<vmem>>, %arg6: memref<256x128xf32, #tpu.memory_space<vmem>>) attributes {dimension_semantics = [#tpu.dimension_semantics<parallel>], iteration_bounds = array<i64: 1>, scalar_prefetch = 0 : i64, scratch_operands = 0 : i64, tpu.core_type = #tpu.core_type<tc>, window_params = [{transform_indices = @transform_0, window_bounds = array<i64: 256, 32>}, {pipeline_mode = #tpu.pipeline_mode<synchronous>, transform_indices = @transform_1, window_bounds = array<i64: 32, 192>}, {pipeline_mode = #tpu.pipeline_mode<synchronous>, transform_indices = @transform_2, window_bounds = array<i64: 1, 192>}, {pipeline_mode = #tpu.pipeline_mode<synchronous>, transform_indices = @transform_3, window_bounds = array<i64: 192, 128>}, {pipeline_mode = #tpu.pipeline_mode<synchronous>, transform_indices = @transform_4, window_bounds = array<i64: 1, 128>}, {transform_indices = @transform_5, window_bounds = array<i64: 256, 128>}]} {
    %c0 = arith.constant 0 : index
    %c0_0 = arith.constant 0 : index
    %0 = vector.load %arg1[%c0, %c0_0] : memref<256x32xf32, #tpu.memory_space<vmem>>, vector<256x32xf32>
    %c0_1 = arith.constant 0 : index
    %c0_2 = arith.constant 0 : index
    %1 = vector.load %arg2[%c0_1, %c0_2] : memref<32x192xf32, #tpu.memory_space<vmem>>, vector<32x192xf32>
    %cst = arith.constant dense<0.000000e+00> : vector<256x192xf32>
    %2 = tpu.matmul %0, %1, %cst {dimension_numbers = #tpu.dot_dimension_numbers<[1], [0], [0], [1], [0, 0, 1, 1], [], []>} : vector<256x32xf32>, vector<32x192xf32>, vector<256x192xf32> -> vector<256x192xf32>
    %c0_3 = arith.constant 0 : index
    %c0_4 = arith.constant 0 : index
    %3 = vector.load %arg3[%c0_3, %c0_4] : memref<1x192xf32, #tpu.memory_space<vmem>>, vector<1x192xf32>
    %4 = vector.broadcast %3 : vector<1x192xf32> to vector<256x192xf32>
    %5 = arith.addf %2, %4 : vector<256x192xf32>
    %cst_5 = arith.constant 0.000000e+00 : f32
    %6 = vector.broadcast %cst_5 : f32 to vector<256x192xf32>
    %7 = arith.maximumf %5, %6 : vector<256x192xf32>
    %c0_6 = arith.constant 0 : index
    %c0_7 = arith.constant 0 : index
    %8 = vector.load %arg4[%c0_6, %c0_7] : memref<192x128xf32, #tpu.memory_space<vmem>>, vector<192x128xf32>
    %cst_8 = arith.constant dense<0.000000e+00> : vector<256x128xf32>
    %9 = tpu.matmul %7, %8, %cst_8 {dimension_numbers = #tpu.dot_dimension_numbers<[1], [0], [0], [1], [0, 0, 1, 1], [], []>} : vector<256x192xf32>, vector<192x128xf32>, vector<256x128xf32> -> vector<256x128xf32>
    %c0_9 = arith.constant 0 : index
    %c0_10 = arith.constant 0 : index
    %10 = vector.load %arg5[%c0_9, %c0_10] : memref<1x128xf32, #tpu.memory_space<vmem>>, vector<1x128xf32>
    %11 = vector.broadcast %10 : vector<1x128xf32> to vector<256x128xf32>
    %12 = arith.addf %9, %11 : vector<256x128xf32>
    %c0_11 = arith.constant 0 : index
    %c0_12 = arith.constant 0 : index
    %13 = vector.load %arg6[%c0_11, %c0_12] : memref<256x128xf32, #tpu.memory_space<vmem>>, vector<256x128xf32>
    tpu.vector_store %arg6[%c0_11, %c0_12], %12 {strides = array<i32>} : memref<256x128xf32, #tpu.memory_space<vmem>>, vector<256x128xf32>,
    return
  }
  func.func @transform_0(%arg0: i32) -> (i32, i32) {
    %c0_i32 = arith.constant 0 : i32
    %c0_i32_0 = arith.constant 0 : i32
    return %arg0, %c0_i32 : i32, i32
  }
  func.func @transform_1(%arg0: i32) -> (i32, i32) {
    %c0_i32 = arith.constant 0 : i32
    %c0_i32_0 = arith.constant 0 : i32
    %c0_i32_1 = arith.constant 0 : i32
    return %c0_i32, %c0_i32_0 : i32, i32
  }
  func.func @transform_2(%arg0: i32) -> (i32, i32) {
    %c0_i32 = arith.constant 0 : i32
    %c0_i32_0 = arith.constant 0 : i32
    %c0_i32_1 = arith.constant 0 : i32
    return %c0_i32, %c0_i32_0 : i32, i32
  }
  func.func @transform_3(%arg0: i32) -> (i32, i32) {
    %c0_i32 = arith.constant 0 : i32
    %c0_i32_0 = arith.constant 0 : i32
    %c0_i32_1 = arith.constant 0 : i32
    return %c0_i32, %c0_i32_0 : i32, i32
  }
  func.func @transform_4(%arg0: i32) -> (i32, i32) {
    %c0_i32 = arith.constant 0 : i32
    %c0_i32_0 = arith.constant 0 : i32
    %c0_i32_1 = arith.constant 0 : i32
    return %c0_i32, %c0_i32_0 : i32, i32
  }
  func.func @transform_5(%arg0: i32) -> (i32, i32) {
    %c0_i32 = arith.constant 0 : i32
    %c0_i32_0 = arith.constant 0 : i32
    return %arg0, %c0_i32 : i32, i32
  }
}

</mosaic_0001>

<bundles_post_ra>
// kernel: tpu_custom_call.1
= control target key start
LH: loop header
LB: loop body
LE: loop exit
PB: predicated region body
PF: predicated region fallthrough
CT: control target
= control target key end

     0   :  { %v1054_v7 = vmov 0.0   ;;  %vm73_vm0 = vcmask 261120   ;;  %v1055_v14 = vmov 0.0|0.0   ;;  %s1521_s0 = inlined_call_operand.vmem [shape: f32[256,32], index: 0, kind: input, shape index: {}]   ;;  %s1522_s1 = inlined_call_operand.vmem [shape: f32[32,192], index: 1, kind: input, shape index: {}]   ;;  %s1523_s2 = inlined_call_operand.vmem [shape: f32[1,192], index: 2, kind: input, shape index: {}]   ;;  %s1524_s3 = inlined_call_operand.vmem [shape: f32[192,128], index: 3, kind: input, shape index: {}]   ;;  %s1525_s4 = inlined_call_operand.vmem [shape: f32[1,128], index: 4, kind: input, shape index: {}]   ;;  %s1526_s5 = inlined_call_operand.hbm [shape: f32[256,128], index: 5, kind: output, shape index: {}]  }
   0x1   :  { %v54_v0 = vld [vmem:[%s1522_s1 + $0x8] sm:$0xff]  ;;  %v56_v1 = vld [vmem:[%s1522_s1 + $0x18] sm:$0xff]  ;;  %v53_v2 = vld [vmem:[%s1522_s1] sm:$0xff]  ;;  %234 = vmatprep.mubr.f32.mxu0 %v1054_v7  ;;  %1001 = vmatprep.subr.bf16.mxu1 %v1055_v14 }
   0x2   :  { %v957_v3 = vpack.c.bf16 %v56_v1, %v54_v0  ;;  %v55_v4 = vld [vmem:[%s1522_s1 + $0x10] sm:$0xff]  ;;  %v58_v5 = vld [vmem:[%s1522_s1 + $0x28] sm:$0xff]  ;;  %v60_v6 = vld [vmem:[%s1522_s1 + $0x38] sm:$0xff] }
   0x3   :  { %v959_v8 = vpack.c.bf16 %v55_v4, %v53_v2  ;;  %v961_v9 = vpack.c.bf16 %v60_v6, %v58_v5  ;;  %v57_v10 = vld [vmem:[%s1522_s1 + $0x20] sm:$0xff]  ;;  %v59_v11 = vld [vmem:[%s1522_s1 + $0x30] sm:$0xff]  ;;  %v22_v15 = vld [vmem:[%s1521_s0 + $0x8] sm:$0xff] }
   0x4   :  { %958 = vmatprep.subr.bf16.mxu0 %v957_v3  ;;  %v963_v12 = vpack.c.bf16 %v59_v11, %v57_v10  ;;  %v21_v13 = vld [vmem:[%s1521_s0] sm:$0xff]  ;;  %v492_v17 = vld [vmem:[%s1524_s3 + $0x8] sm:$0xff]  ;;  %v493_v19 = vld [vmem:[%s1524_s3 + $0x10] sm:$0xff] }
   0x5   :  { %960 = vmatpush1.bf16.msra.mxu0 %v959_v8  ;;  %v491_v16 = vld [vmem:[%s1524_s3] sm:$0xff]  ;;  %v494_v20 = vld [vmem:[%s1524_s3 + $0x18] sm:$0xff]  ;;  %v23_v21 = vld [vmem:[%s1521_s0 + $0x10] sm:$0xff] }
   0x6   :  { %962 = vmatprep.subr.bf16.mxu0 %v961_v9  ;;  %v966_v18 = vpack.c.bf16 %v492_v17, %v491_v16  ;;  %v969_v22 = vpack.c.bf16 %v494_v20, %v493_v19  ;;  %v495_v23 = vld [vmem:[%s1524_s3 + $0x20] sm:$0xff]  ;;  %v496_v24 = vld [vmem:[%s1524_s3 + $0x28] sm:$0xff]  ;;  %v24_v25 = vld [vmem:[%s1521_s0 + $0x18] sm:$0xff] }
   0x7   :  { %v972_v26 = vpack.c.bf16 %v496_v24, %v495_v23 }
   0x8   :  { %1013 = vmatpush1.bf16.msra.mxu1 %v966_v18 }
   0x9   :  { %964 = vmatpush1.bf16.msra.mxu0 %v963_v12  ;;  %1002 = vmatprep.subr.bf16.mxu1 %v1055_v14 }
   0xa   :  { %965 = vmatprep.subr.bf16.mxu0 %v1055_v14 }
   0xc   :  { %892 = vmatmul.mubr.msk.f32.vlgmr.msra.gmra.mrb[0].mxu0 %vm73_vm0, %v21_v13 }
   0xd   :  { %240 = vmatprep.mubr.f32.mxu0 %v1054_v7  ;;  %967 = vmatpush1.bf16.msra.mxu0 %v966_v18 }
   0xe   :  { %968 = vmatprep.subr.bf16.mxu0 %v1055_v14 }
  0x10   :  { %893 = vmatmul.mubr.msk.f32.gmra.mrb[2].mxu0 %vm73_vm0, %v22_v15 }
  0x11   :  { %246 = vmatprep.mubr.f32.mxu0 %v1054_v7  ;;  %970 = vmatpush1.bf16.msra.mxu0 %v969_v22 }
  0x14   :  { %894 = vmatmul.mubr.msk.f32.gmra.mrb[4].mxu0 %vm73_vm0, %v23_v21 }
  0x15   :  { %252 = vmatprep.mubr.f32.mxu0 %v1054_v7 }
  0x16   :  { %10 = vsyncpa [#allocation3], 0  ;;  %971 = vmatprep.subr.bf16.mxu0 %v1055_v14  ;;  %v497_v27 = vld [vmem:[%s1524_s3 + $0x30] sm:$0xff]  ;;  %v498_v28 = vld [vmem:[%s1524_s3 + $0x38] sm:$0xff]  ;;  %1014 = vmatpush1.bf16.msra.mxu1 %v969_v22  ;;  %v63_v19 = vlaneseq  ;;  %vm522_vm1 = vcmask 523264  }
  0x17   :  { %1003 = vmatprep.subr.bf16.mxu1 %v1055_v14  ;;  %v25_v29 = vld [vmem:[%s1521_s0 + $0x20] sm:$0xff]  ;;  %973 = vmatpush1.bf16.msra.mxu0 %v972_v26  ;;  %v975_v30 = vpack.c.bf16 %v498_v28, %v497_v27  ;;  %v500_v32 = vld [vmem:[%s1524_s3 + $0x48] sm:$0xff]  ;;  %v501_v35 = vld [vmem:[%s1524_s3 + $0x50] sm:$0xff] }
  0x18   :  { %895 = vmatmul.mubr.msk.f32.gmra.mrb[6].mxu0 %vm73_vm0, %v24_v25  ;;  %974 = vmatprep.subr.bf16.mxu0 %v1055_v14  ;;  %v499_v31 = vld [vmem:[%s1524_s3 + $0x40] sm:$0xff]  ;;  %v26_v33 = vld [vmem:[%s1521_s0 + $0x28] sm:$0xff]  ;;  %v502_v36 = vld [vmem:[%s1524_s3 + $0x58] sm:$0xff]  ;;  %v64_v20 = vshrl.u32 %v63_v19, 7 }
  0x19   :  { %258 = vmatprep.mubr.f32.mxu0 %v1054_v7  ;;  %v978_v34 = vpack.c.bf16 %v500_v32, %v499_v31  ;;  %v27_v37 = vld [vmem:[%s1521_s0 + $0x30] sm:$0xff]  ;;  %v981_v38 = vpack.c.bf16 %v502_v36, %v501_v35  ;;  %v503_v39 = vld [vmem:[%s1524_s3 + $0x60] sm:$0xff]  ;;  %v504_v40 = vld [vmem:[%s1524_s3 + $0x68] sm:$0xff] }
  0x1a   :  { %1015 = vmatpush1.bf16.msra.mxu1 %v972_v26  ;;  %v28_v41 = vld [vmem:[%s1521_s0 + $0x38] sm:$0xff]  ;;  %v984_v42 = vpack.c.bf16 %v504_v40, %v503_v39  ;;  %v505_v43 = vld [vmem:[%s1524_s3 + $0x70] sm:$0xff]  ;;  %v29_v45 = vld [vmem:[%s1521_s0 + $0x40] sm:$0xff]  ;;  %v65_v21 = vsub.s32 0, %v64_v20  ;;  %v69_v23 = vsub.s32 1, %v64_v20 }
  0x1b   :  { %1004 = vmatprep.subr.bf16.mxu1 %v1055_v14  ;;  %976 = vmatpush1.bf16.msra.mxu0 %v975_v30  ;;  %v506_v44 = vld [vmem:[%s1524_s3 + $0x78] sm:$0xff]  ;;  %v507_v47 = vld [vmem:[%s1524_s3 + $0x80] sm:$0xff]  ;;  %v508_v48 = vld [vmem:[%s1524_s3 + $0x88] sm:$0xff] }
  0x1c   :  { %896 = vmatmul.mubr.msk.f32.gmra.mrb[8].mxu0 %vm73_vm0, %v25_v29  ;;  %977 = vmatprep.subr.bf16.mxu0 %v1055_v14  ;;  %v987_v46 = vpack.c.bf16 %v506_v44, %v505_v43  ;;  %v30_v49 = vld [vmem:[%s1521_s0 + $0x48] sm:$0xff]  ;;  %v990_v50 = vpack.c.bf16 %v508_v48, %v507_v47  ;;  %v509_v51 = vld [vmem:[%s1524_s3 + $0x90] sm:$0xff]  ;;  %v510_v52 = vld [vmem:[%s1524_s3 + $0x98] sm:$0xff] }
  0x1d   :  { %264 = vmatprep.mubr.f32.mxu0 %v1054_v7  ;;  %v31_v53 = vld [vmem:[%s1521_s0 + $0x50] sm:$0xff]  ;;  %v993_v54 = vpack.c.bf16 %v510_v52, %v509_v51  ;;  %v32_v55 = vld [vmem:[%s1521_s0 + $0x58] sm:$0xff]  ;;  %v33_v56 = vld [vmem:[%s1521_s0 + $0x60] sm:$0xff] }
  0x1e   :  { %1016 = vmatpush1.bf16.msra.mxu1 %v975_v30  ;;  %v34_v57 = vld [vmem:[%s1521_s0 + $0x68] sm:$0xff]  ;;  %v35_v58 = vld [vmem:[%s1521_s0 + $0x70] sm:$0xff]  ;;  %v36_v59 = vld [vmem:[%s1521_s0 + $0x78] sm:$0xff] }
  0x1f   :  { %1005 = vmatprep.subr.bf16.mxu1 %v1055_v14  ;;  %979 = vmatpush1.bf16.msra.mxu0 %v978_v34  ;;  %v37_v60 = vld [vmem:[%s1521_s0 + $0x80] sm:$0xff]  ;;  %v38_v61 = vld [vmem:[%s1521_s0 + $0x88] sm:$0xff]  ;;  %v39_v62 = vld [vmem:[%s1521_s0 + $0x90] sm:$0xff] }
  0x20   :  { %897 = vmatmul.mubr.msk.f32.gmra.mrb[10].mxu0 %vm73_vm0, %v26_v33  ;;  %980 = vmatprep.subr.bf16.mxu0 %v1055_v14  ;;  %v40_v63 = vld [vmem:[%s1521_s0 + $0x98] sm:$0xff]  ;;  %v41_v0 = vld [vmem:[%s1521_s0 + $0xa0] sm:$0xff]  ;;  %v512_v2 = vld [vmem:[%s1524_s3 + $0xa8] sm:$0xff] }
  0x21   :  { %270 = vmatprep.mubr.f32.mxu0 %v1054_v7  ;;  %v511_v1 = vld [vmem:[%s1524_s3 + $0xa0] sm:$0xff]  ;;  %v42_v3 = vld [vmem:[%s1521_s0 + $0xa8] sm:$0xff]  ;;  %v513_v5 = vld [vmem:[%s1524_s3 + $0xb0] sm:$0xff] }
  0x22   :  { %1017 = vmatpush1.bf16.msra.mxu1 %v978_v34  ;;  %v996_v4 = vpack.c.bf16 %v512_v2, %v511_v1  ;;  %v514_v6 = vld [vmem:[%s1524_s3 + $0xb8] sm:$0xff]  ;;  %v43_v8 = vld [vmem:[%s1521_s0 + $0xb0] sm:$0xff]  ;;  %v45_v11 = vld [vmem:[%s1521_s0 + $0xc0] sm:$0xff] }
  0x23   :  { %1006 = vmatprep.subr.bf16.mxu1 %v1055_v14  ;;  %982 = vmatpush1.bf16.msra.mxu0 %v981_v38  ;;  %v999_v9 = vpack.c.bf16 %v514_v6, %v513_v5  ;;  %v44_v10 = vld [vmem:[%s1521_s0 + $0xb8] sm:$0xff]  ;;  %v46_v12 = vld [vmem:[%s1521_s0 + $0xc8] sm:$0xff]  ;;  %v47_v13 = vld [vmem:[%s1521_s0 + $0xd0] sm:$0xff] }
  0x24   :  { %898 = vmatmul.mubr.msk.f32.gmra.mrb[12].mxu0 %vm73_vm0, %v27_v37  ;;  %983 = vmatprep.subr.bf16.mxu0 %v1055_v14  ;;  %v49_v15 = vld [vmem:[%s1521_s0 + $0xe0] sm:$0xff]  ;;  %v50_v16 = vld [vmem:[%s1521_s0 + $0xe8] sm:$0xff]  ;;  %v51_v17 = vld [vmem:[%s1521_s0 + $0xf0] sm:$0xff] }
  0x25   :  { %276 = vmatprep.mubr.f32.mxu0 %v1054_v7  ;;  %v52_v18 = vld [vmem:[%s1521_s0 + $0xf8] sm:$0xff]  ;;  %v61_v22 = vld [vmem:[%s1523_s2] sm:$0x3] }
  0x26   :  { %1018 = vmatpush1.bf16.msra.mxu1 %v981_v38  ;;  %v1372_v24 = vrot.slane %v61_v22, %v65_v21  ;;  %v1374_v25 = vrot.slane %v61_v22, %v69_v23 }
  0x27   :  { %1007 = vmatprep.subr.bf16.mxu1 %v1055_v14  ;;  %985 = vmatpush1.bf16.msra.mxu0 %v984_v42 }
  0x28   :  { %899 = vmatmul.mubr.msk.f32.gmra.mrb[14].mxu0 %vm73_vm0, %v28_v41  ;;  %986 = vmatprep.subr.bf16.mxu0 %v1055_v14 }
  0x29   :  { %282 = vmatprep.mubr.f32.mxu0 %v1054_v7 }
  0x2a   :  { %1019 = vmatpush1.bf16.msra.mxu1 %v984_v42 }
  0x2b   :  { %1008 = vmatprep.subr.bf16.mxu1 %v1055_v14  ;;  %988 = vmatpush1.bf16.msra.mxu0 %v987_v46 }
  0x2c   :  { %900 = vmatmul.mubr.msk.f32.gmra.mrb[16].mxu0 %vm73_vm0, %v29_v45  ;;  %989 = vmatprep.subr.bf16.mxu0 %v1055_v14 }
  0x2d   :  { %288 = vmatprep.mubr.f32.mxu0 %v1054_v7 }
  0x2e   :  { %1020 = vmatpush1.bf16.msra.mxu1 %v987_v46 }
  0x2f   :  { %1009 = vmatprep.subr.bf16.mxu1 %v1055_v14  ;;  %991 = vmatpush1.bf16.msra.mxu0 %v990_v50 }
  0x30   :  { %901 = vmatmul.mubr.msk.f32.gmra.mrb[18].mxu0 %vm73_vm0, %v30_v49  ;;  %992 = vmatprep.subr.bf16.mxu0 %v1055_v14 }
  0x31   :  { %294 = vmatprep.mubr.f32.mxu0 %v1054_v7 }
  0x32   :  { %1021 = vmatpush1.bf16.msra.mxu1 %v990_v50 }
  0x33   :  { %1010 = vmatprep.subr.bf16.mxu1 %v1055_v14  ;;  %994 = vmatpush1.bf16.msra.mxu0 %v993_v54 }
  0x34   :  { %902 = vmatmul.mubr.msk.f32.gmra.mrb[20].mxu0 %vm73_vm0, %v31_v53  ;;  %995 = vmatprep.subr.bf16.mxu0 %v1055_v14 }
  0x35   :  { %300 = vmatprep.mubr.f32.mxu0 %v1054_v7 }
  0x36   :  { %1022 = vmatpush1.bf16.msra.mxu1 %v993_v54 }
  0x37   :  { %1011 = vmatprep.subr.bf16.mxu1 %v1055_v14  ;;  %997 = vmatpush1.bf16.msra.mxu0 %v996_v4 }
  0x38   :  { %903 = vmatmul.mubr.msk.f32.gmra.mrb[22].mxu0 %vm73_vm0, %v32_v55  ;;  %998 = vmatprep.subr.bf16.mxu0 %v1055_v14 }
  0x39   :  { %306 = vmatprep.mubr.f32.mxu0 %v1054_v7 }
  0x3a   :  { %1023 = vmatpush1.bf16.msra.mxu1 %v996_v4 }
  0x3b   :  { %1012 = vmatprep.subr.bf16.mxu1 %v1055_v14  ;;  %1000 = vmatpush1.bf16.msra.mxu0 %v999_v9  ;;  %v48_v14 = vld [vmem:[%s1521_s0 + $0xd8] sm:$0xff] }
  0x3c   :  { %904 = vmatmul.mubr.msk.f32.gmra.mrb[24].mxu0 %vm73_vm0, %v33_v56 }
  0x3d   :  { %312 = vmatprep.mubr.f32.mxu0 %v1054_v7 }
  0x3e   :  { %1024 = vmatpush1.bf16.msra.mxu1 %v999_v9 }
  0x40   :  { %905 = vmatmul.mubr.msk.f32.gmra.mrb[26].mxu0 %vm73_vm0, %v34_v57 }
  0x41   :  { %318 = vmatprep.mubr.f32.mxu0 %v1054_v7 }
  0x44   :  { %906 = vmatmul.mubr.msk.f32.gmra.mrb[28].mxu0 %vm73_vm0, %v35_v58 }
  0x45   :  { %324 = vmatprep.mubr.f32.mxu0 %v1054_v7 }
  0x48   :  { %907 = vmatmul.mubr.msk.f32.gmra.mrb[30].mxu0 %vm73_vm0, %v36_v59 }
  0x49   :  { %330 = vmatprep.mubr.f32.mxu0 %v1054_v7 }
  0x4c   :  { %908 = vmatmul.mubr.msk.f32.gmra.mrb[32].mxu0 %vm73_vm0, %v37_v60 }
  0x4d   :  { %336 = vmatprep.mubr.f32.mxu0 %v1054_v7 }
  0x50   :  { %909 = vmatmul.mubr.msk.f32.gmra.mrb[34].mxu0 %vm73_vm0, %v38_v61 }
  0x51   :  { %342 = vmatprep.mubr.f32.mxu0 %v1054_v7 }
  0x54   :  { %910 = vmatmul.mubr.msk.f32.gmra.mrb[36].mxu0 %vm73_vm0, %v39_v62 }
  0x55   :  { %348 = vmatprep.mubr.f32.mxu0 %v1054_v7 }
  0x58   :  { %911 = vmatmul.mubr.msk.f32.gmra.mrb[38].mxu0 %vm73_vm0, %v40_v63 }
  0x59   :  { %354 = vmatprep.mubr.f32.mxu0 %v1054_v7 }
  0x5c   :  { %912 = vmatmul.mubr.msk.f32.gmra.mrb[40].mxu0 %vm73_vm0, %v41_v0 }
  0x5d   :  { %360 = vmatprep.mubr.f32.mxu0 %v1054_v7 }
  0x60   :  { %913 = vmatmul.mubr.msk.f32.gmra.mrb[42].mxu0 %vm73_vm0, %v42_v3 }
  0x61   :  { %366 = vmatprep.mubr.f32.mxu0 %v1054_v7 }
  0x64   :  { %914 = vmatmul.mubr.msk.f32.gmra.mrb[44].mxu0 %vm73_vm0, %v43_v8 }
  0x65   :  { %372 = vmatprep.mubr.f32.mxu0 %v1054_v7 }
  0x68   :  { %915 = vmatmul.mubr.msk.f32.gmra.mrb[46].mxu0 %vm73_vm0, %v44_v10 }
  0x69   :  { %378 = vmatprep.mubr.f32.mxu0 %v1054_v7 }
  0x6c   :  { %916 = vmatmul.mubr.msk.f32.gmra.mrb[48].mxu0 %vm73_vm0, %v45_v11 }
  0x6d   :  { %384 = vmatprep.mubr.f32.mxu0 %v1054_v7 }
  0x70   :  { %917 = vmatmul.mubr.msk.f32.gmra.mrb[50].mxu0 %vm73_vm0, %v46_v12 }
  0x71   :  { %390 = vmatprep.mubr.f32.mxu0 %v1054_v7 }
  0x74   :  { %918 = vmatmul.mubr.msk.f32.gmra.mrb[52].mxu0 %vm73_vm0, %v47_v13 }
  0x75   :  { %396 = vmatprep.mubr.f32.mxu0 %v1054_v7 }
  0x78   :  { %919 = vmatmul.mubr.msk.f32.gmra.mrb[54].mxu0 %vm73_vm0, %v48_v14 }
  0x79   :  { %402 = vmatprep.mubr.f32.mxu0 %v1054_v7 }
  0x7c   :  { %920 = vmatmul.mubr.msk.f32.gmra.mrb[56].mxu0 %vm73_vm0, %v49_v15 }
  0x7d   :  { %408 = vmatprep.mubr.f32.mxu0 %v1054_v7 }
  0x80   :  { %921 = vmatmul.mubr.msk.f32.gmra.mrb[58].mxu0 %vm73_vm0, %v50_v16 }
  0x81   :  { %414 = vmatprep.mubr.f32.mxu0 %v1054_v7 }
  0x84   :  { %922 = vmatmul.mubr.msk.f32.gmra.mrb[60].mxu0 %vm73_vm0, %v51_v17 }
  0x85   :  { %420 = vmatprep.mubr.f32.mxu0 %v1054_v7 }
  0x88   :  { %923 = vmatmul.mubr.msk.f32.gmra.mrb[62].mxu0 %vm73_vm0, %v52_v18 }
  0xdf   :  { %v236_v26 = vpop.f32.mrb[0].mxu0 }
  0xe0   :  { %v237_v7 = vadd.f32 %v236_v26, %v1372_v24  ;;  %v238_v27 = vpop.f32.mrb[1].mxu0 }
  0xe1   :  { %v239_v28 = vadd.f32 %v238_v27, %v1374_v25 }
  0xe2   :  { %v427_v31 = vmax.f32 %v237_v7, 0.0 }
  0xe3   :  { %v428_v29 = vmax.f32 %v239_v28, 0.0  ;;  %v242_v30 = vpop.f32.mrb[2].mxu0 }
  0xe4   :  { %v243_v32 = vadd.f32 %v242_v30, %v1372_v24  ;;  %v244_v33 = vpop.f32.mrb[3].mxu0 }
  0xe5   :  { %v245_v34 = vadd.f32 %v244_v33, %v1374_v25  ;;  %925 = vmatprep.mubr.msk.f32.mxu0 %vm522_vm1, %v428_v29 }
  0xe6   :  { %684 = vmatmul.mubr.f32.vlgmr.msra.gmra.mrb[64].mxu0 %v427_v31  ;;  %v429_v37 = vmax.f32 %v243_v32, 0.0 }
  0xe7   :  { %v430_v35 = vmax.f32 %v245_v34, 0.0  ;;  %v248_v36 = vpop.f32.mrb[4].mxu0 }
  0xe8   :  { %v249_v38 = vadd.f32 %v248_v36, %v1372_v24  ;;  %v250_v39 = vpop.f32.mrb[5].mxu0 }
  0xe9   :  { %v251_v40 = vadd.f32 %v250_v39, %v1374_v25  ;;  %926 = vmatprep.mubr.msk.f32.mxu0 %vm522_vm1, %v430_v35 }
  0xea   :  { %689 = vmatmul.mubr.f32.gmra.mrb[66].mxu0 %v429_v37  ;;  %v431_v43 = vmax.f32 %v249_v38, 0.0 }
  0xeb   :  { %v432_v41 = vmax.f32 %v251_v40, 0.0  ;;  %v254_v42 = vpop.f32.mrb[6].mxu0 }
  0xec   :  { %v255_v44 = vadd.f32 %v254_v42, %v1372_v24  ;;  %v256_v45 = vpop.f32.mrb[7].mxu0 }
  0xed   :  { %v257_v46 = vadd.f32 %v256_v45, %v1374_v25  ;;  %927 = vmatprep.mubr.msk.f32.mxu0 %vm522_vm1, %v432_v41 }
  0xee   :  { %694 = vmatmul.mubr.f32.gmra.mrb[68].mxu0 %v431_v43  ;;  %v433_v49 = vmax.f32 %v255_v44, 0.0 }
  0xef   :  { %v434_v47 = vmax.f32 %v257_v46, 0.0  ;;  %v260_v48 = vpop.f32.mrb[8].mxu0 }
  0xf0   :  { %v261_v50 = vadd.f32 %v260_v48, %v1372_v24  ;;  %v262_v51 = vpop.f32.mrb[9].mxu0 }
  0xf1   :  { %v263_v52 = vadd.f32 %v262_v51, %v1374_v25  ;;  %928 = vmatprep.mubr.msk.f32.mxu0 %vm522_vm1, %v434_v47 }
  0xf2   :  { %699 = vmatmul.mubr.f32.gmra.mrb[70].mxu0 %v433_v49  ;;  %v435_v55 = vmax.f32 %v261_v50, 0.0 }
  0xf3   :  { %v436_v53 = vmax.f32 %v263_v52, 0.0  ;;  %v266_v54 = vpop.f32.mrb[10].mxu0 }
  0xf4   :  { %v267_v56 = vadd.f32 %v266_v54, %v1372_v24  ;;  %v268_v57 = vpop.f32.mrb[11].mxu0 }
  0xf5   :  { %v269_v58 = vadd.f32 %v268_v57, %v1374_v25  ;;  %929 = vmatprep.mubr.msk.f32.mxu0 %vm522_vm1, %v436_v53 }
  0xf6   :  { %704 = vmatmul.mubr.f32.gmra.mrb[72].mxu0 %v435_v55  ;;  %v437_v61 = vmax.f32 %v267_v56, 0.0 }
  0xf7   :  { %v438_v59 = vmax.f32 %v269_v58, 0.0  ;;  %v272_v60 = vpop.f32.mrb[12].mxu0 }
  0xf8   :  { %v273_v62 = vadd.f32 %v272_v60, %v1372_v24  ;;  %v274_v63 = vpop.f32.mrb[13].mxu0 }
  0xf9   :  { %v275_v0 = vadd.f32 %v274_v63, %v1374_v25  ;;  %930 = vmatprep.mubr.msk.f32.mxu1 %vm522_vm1, %v438_v59 }
  0xfa   :  { %709 = vmatmul.mubr.f32.vlgmr.msra.gmra.mrb[0].mxu1 %v437_v61  ;;  %v439_v3 = vmax.f32 %v273_v62, 0.0 }
  0xfb   :  { %v440_v1 = vmax.f32 %v275_v0, 0.0  ;;  %v278_v2 = vpop.f32.mrb[14].mxu0 }
  0xfc   :  { %v279_v4 = vadd.f32 %v278_v2, %v1372_v24  ;;  %v280_v5 = vpop.f32.mrb[15].mxu0 }
  0xfd   :  { %v281_v6 = vadd.f32 %v280_v5, %v1374_v25  ;;  %931 = vmatprep.mubr.msk.f32.mxu1 %vm522_vm1, %v440_v1 }
  0xfe   :  { %714 = vmatmul.mubr.f32.gmra.mrb[2].mxu1 %v439_v3  ;;  %v441_v10 = vmax.f32 %v279_v4, 0.0 }
  0xff   :  { %v442_v8 = vmax.f32 %v281_v6, 0.0  ;;  %v284_v9 = vpop.f32.mrb[16].mxu0 }
 0x100   :  { %v285_v11 = vadd.f32 %v284_v9, %v1372_v24  ;;  %v286_v12 = vpop.f32.mrb[17].mxu0 }
 0x101   :  { %v287_v13 = vadd.f32 %v286_v12, %v1374_v25  ;;  %932 = vmatprep.mubr.msk.f32.mxu1 %vm522_vm1, %v442_v8 }
 0x102   :  { %719 = vmatmul.mubr.f32.gmra.mrb[4].mxu1 %v441_v10  ;;  %v443_v16 = vmax.f32 %v285_v11, 0.0 }
 0x103   :  { %v444_v14 = vmax.f32 %v287_v13, 0.0  ;;  %v290_v15 = vpop.f32.mrb[18].mxu0 }
 0x104   :  { %v291_v17 = vadd.f32 %v290_v15, %v1372_v24  ;;  %v292_v18 = vpop.f32.mrb[19].mxu0 }
 0x105   :  { %v293_v19 = vadd.f32 %v292_v18, %v1374_v25  ;;  %933 = vmatprep.mubr.msk.f32.mxu1 %vm522_vm1, %v444_v14 }
 0x106   :  { %724 = vmatmul.mubr.f32.gmra.mrb[6].mxu1 %v443_v16  ;;  %v445_v22 = vmax.f32 %v291_v17, 0.0 }
 0x107   :  { %v446_v20 = vmax.f32 %v293_v19, 0.0  ;;  %v296_v21 = vpop.f32.mrb[20].mxu0 }
 0x108   :  { %v297_v23 = vadd.f32 %v296_v21, %v1372_v24  ;;  %v298_v26 = vpop.f32.mrb[21].mxu0 }
 0x109   :  { %v299_v7 = vadd.f32 %v298_v26, %v1374_v25  ;;  %934 = vmatprep.mubr.msk.f32.mxu1 %vm522_vm1, %v446_v20 }
 0x10a   :  { %729 = vmatmul.mubr.f32.gmra.mrb[8].mxu1 %v445_v22  ;;  %v447_v29 = vmax.f32 %v297_v23, 0.0 }
 0x10b   :  { %v448_v27 = vmax.f32 %v299_v7, 0.0  ;;  %v302_v28 = vpop.f32.mrb[22].mxu0 }
 0x10c   :  { %v303_v30 = vadd.f32 %v302_v28, %v1372_v24  ;;  %v304_v31 = vpop.f32.mrb[23].mxu0 }
 0x10d   :  { %v305_v32 = vadd.f32 %v304_v31, %v1374_v25  ;;  %935 = vmatprep.mubr.msk.f32.mxu1 %vm522_vm1, %v448_v27 }
 0x10e   :  { %734 = vmatmul.mubr.f32.gmra.mrb[10].mxu1 %v447_v29  ;;  %v449_v35 = vmax.f32 %v303_v30, 0.0 }
 0x10f   :  { %v450_v33 = vmax.f32 %v305_v32, 0.0  ;;  %v308_v34 = vpop.f32.mrb[24].mxu0 }
 0x110   :  { %v309_v36 = vadd.f32 %v308_v34, %v1372_v24  ;;  %v310_v37 = vpop.f32.mrb[25].mxu0 }
 0x111   :  { %v311_v38 = vadd.f32 %v310_v37, %v1374_v25  ;;  %936 = vmatprep.mubr.msk.f32.mxu1 %vm522_vm1, %v450_v33 }
 0x112   :  { %739 = vmatmul.mubr.f32.gmra.mrb[12].mxu1 %v449_v35  ;;  %v451_v41 = vmax.f32 %v309_v36, 0.0 }
 0x113   :  { %v452_v39 = vmax.f32 %v311_v38, 0.0  ;;  %v314_v40 = vpop.f32.mrb[26].mxu0 }
 0x114   :  { %v315_v42 = vadd.f32 %v314_v40, %v1372_v24  ;;  %v316_v43 = vpop.f32.mrb[27].mxu0 }
 0x115   :  { %v317_v44 = vadd.f32 %v316_v43, %v1374_v25  ;;  %937 = vmatprep.mubr.msk.f32.mxu1 %vm522_vm1, %v452_v39 }
 0x116   :  { %744 = vmatmul.mubr.f32.gmra.mrb[14].mxu1 %v451_v41  ;;  %v453_v47 = vmax.f32 %v315_v42, 0.0 }
 0x117   :  { %v454_v45 = vmax.f32 %v317_v44, 0.0  ;;  %v320_v46 = vpop.f32.mrb[28].mxu0 }
 0x118   :  { %v321_v48 = vadd.f32 %v320_v46, %v1372_v24  ;;  %v322_v49 = vpop.f32.mrb[29].mxu0 }
 0x119   :  { %v323_v50 = vadd.f32 %v322_v49, %v1374_v25  ;;  %938 = vmatprep.mubr.msk.f32.mxu1 %vm522_vm1, %v454_v45 }
 0x11a   :  { %749 = vmatmul.mubr.f32.gmra.mrb[16].mxu1 %v453_v47  ;;  %v455_v53 = vmax.f32 %v321_v48, 0.0 }
 0x11b   :  { %v456_v51 = vmax.f32 %v323_v50, 0.0  ;;  %v326_v52 = vpop.f32.mrb[30].mxu0 }
 0x11c   :  { %v327_v54 = vadd.f32 %v326_v52, %v1372_v24  ;;  %v328_v55 = vpop.f32.mrb[31].mxu0 }
 0x11d   :  { %v329_v56 = vadd.f32 %v328_v55, %v1374_v25  ;;  %939 = vmatprep.mubr.msk.f32.mxu1 %vm522_vm1, %v456_v51 }
 0x11e   :  { %754 = vmatmul.mubr.f32.gmra.mrb[18].mxu1 %v455_v53  ;;  %v457_v59 = vmax.f32 %v327_v54, 0.0 }
 0x11f   :  { %v458_v57 = vmax.f32 %v329_v56, 0.0  ;;  %v332_v58 = vpop.f32.mrb[32].mxu0 }
 0x120   :  { %v333_v60 = vadd.f32 %v332_v58, %v1372_v24  ;;  %v334_v61 = vpop.f32.mrb[33].mxu0 }
 0x121   :  { %v335_v62 = vadd.f32 %v334_v61, %v1374_v25  ;;  %940 = vmatprep.mubr.msk.f32.mxu1 %vm522_vm1, %v458_v57 }
 0x122   :  { %759 = vmatmul.mubr.f32.gmra.mrb[20].mxu1 %v457_v59  ;;  %v459_v1 = vmax.f32 %v333_v60, 0.0 }
 0x123   :  { %v460_v63 = vmax.f32 %v335_v62, 0.0  ;;  %v338_v0 = vpop.f32.mrb[34].mxu0 }
 0x124   :  { %v339_v2 = vadd.f32 %v338_v0, %v1372_v24  ;;  %v340_v3 = vpop.f32.mrb[35].mxu0 }
 0x125   :  { %v341_v4 = vadd.f32 %v340_v3, %v1374_v25  ;;  %941 = vmatprep.mubr.msk.f32.mxu1 %vm522_vm1, %v460_v63 }
 0x126   :  { %764 = vmatmul.mubr.f32.gmra.mrb[22].mxu1 %v459_v1  ;;  %v461_v8 = vmax.f32 %v339_v2, 0.0 }
 0x127   :  { %v462_v5 = vmax.f32 %v341_v4, 0.0  ;;  %v344_v6 = vpop.f32.mrb[36].mxu0 }
 0x128   :  { %v345_v9 = vadd.f32 %v344_v6, %v1372_v24  ;;  %v346_v10 = vpop.f32.mrb[37].mxu0 }
 0x129   :  { %v347_v11 = vadd.f32 %v346_v10, %v1374_v25  ;;  %942 = vmatprep.mubr.msk.f32.mxu1 %vm522_vm1, %v462_v5 }
 0x12a   :  { %769 = vmatmul.mubr.f32.gmra.mrb[24].mxu1 %v461_v8  ;;  %v463_v14 = vmax.f32 %v345_v9, 0.0 }
 0x12b   :  { %v464_v12 = vmax.f32 %v347_v11, 0.0  ;;  %v350_v13 = vpop.f32.mrb[38].mxu0 }
 0x12c   :  { %v351_v15 = vadd.f32 %v350_v13, %v1372_v24  ;;  %v352_v16 = vpop.f32.mrb[39].mxu0 }
 0x12d   :  { %v353_v17 = vadd.f32 %v352_v16, %v1374_v25  ;;  %943 = vmatprep.mubr.msk.f32.mxu1 %vm522_vm1, %v464_v12 }
 0x12e   :  { %774 = vmatmul.mubr.f32.gmra.mrb[26].mxu1 %v463_v14  ;;  %v465_v20 = vmax.f32 %v351_v15, 0.0 }
 0x12f   :  { %v466_v18 = vmax.f32 %v353_v17, 0.0  ;;  %v356_v19 = vpop.f32.mrb[40].mxu0 }
 0x130   :  { %v357_v21 = vadd.f32 %v356_v19, %v1372_v24  ;;  %v358_v22 = vpop.f32.mrb[41].mxu0 }
 0x131   :  { %v359_v23 = vadd.f32 %v358_v22, %v1374_v25  ;;  %944 = vmatprep.mubr.msk.f32.mxu1 %vm522_vm1, %v466_v18 }
 0x132   :  { %779 = vmatmul.mubr.f32.gmra.mrb[28].mxu1 %v465_v20  ;;  %v467_v27 = vmax.f32 %v357_v21, 0.0 }
 0x133   :  { %v468_v26 = vmax.f32 %v359_v23, 0.0  ;;  %v362_v7 = vpop.f32.mrb[42].mxu0 }
 0x134   :  { %v363_v28 = vadd.f32 %v362_v7, %v1372_v24  ;;  %v364_v29 = vpop.f32.mrb[43].mxu0 }
 0x135   :  { %v365_v30 = vadd.f32 %v364_v29, %v1374_v25  ;;  %945 = vmatprep.mubr.msk.f32.mxu1 %vm522_vm1, %v468_v26 }
 0x136   :  { %784 = vmatmul.mubr.f32.gmra.mrb[30].mxu1 %v467_v27  ;;  %v469_v33 = vmax.f32 %v363_v28, 0.0 }
 0x137   :  { %v470_v31 = vmax.f32 %v365_v30, 0.0  ;;  %v368_v32 = vpop.f32.mrb[44].mxu0 }
 0x138   :  { %v369_v34 = vadd.f32 %v368_v32, %v1372_v24  ;;  %v370_v35 = vpop.f32.mrb[45].mxu0 }
 0x139   :  { %v371_v36 = vadd.f32 %v370_v35, %v1374_v25  ;;  %946 = vmatprep.mubr.msk.f32.mxu1 %vm522_vm1, %v470_v31  ;;  %v1475_v31 = vld [vmem:[%s1525_s4] ss:$0 sm:$0xff]  ;;  %s1056_s4 = smov [#allocation2]  }
 0x13a   :  { %789 = vmatmul.mubr.f32.gmra.mrb[32].mxu1 %v469_v33  ;;  %v471_v39 = vmax.f32 %v369_v34, 0.0  ;;  %s881_s17 = sshll.u32 %s1056_s4, 4  ;;  %s882_s17 = int_to_ptr.vmem [resolvable:$true] %s881_s17 }
 0x13b   :  { %v472_v37 = vmax.f32 %v371_v36, 0.0  ;;  %v374_v38 = vpop.f32.mrb[46].mxu0  ;;  %s1030_s18 = scalar_lea.vmem %s882_s17, 4096  ;;  %p1035_p1 = scmp.lt.s32.totalorder %s882_s17, %s882_s17 }
 0x13c   :  { %v375_v40 = vadd.f32 %v374_v38, %v1372_v24  ;;  %v376_v41 = vpop.f32.mrb[47].mxu0  ;;  %p1031_p0 = scmp.ne.s32.totalorder %s882_s17, %s1030_s18  ;;  %p1036_p2 = scmp.lt.s32.totalorder %s1030_s18, %s1030_s18 }
 0x13d   :  { %v377_v42 = vadd.f32 %v376_v41, %v1374_v25  ;;  %947 = vmatprep.mubr.msk.f32.mxu1 %vm522_vm1, %v472_v37 }
 0x13e   :  { %794 = vmatmul.mubr.f32.gmra.mrb[34].mxu1 %v471_v39  ;;  %v473_v45 = vmax.f32 %v375_v40, 0.0  ;;  %p1037_p3 = por %p1036_p2, %p1035_p1 }
 0x13f   :  { %v474_v43 = vmax.f32 %v377_v42, 0.0  ;;  %v380_v44 = vpop.f32.mrb[48].mxu0 }
 0x140   :  { %v381_v46 = vadd.f32 %v380_v44, %v1372_v24  ;;  %v382_v47 = vpop.f32.mrb[49].mxu0  ;;  %p1038_p4 = pnand %p1037_p3, %p1031_p0 }
 0x141   :  { %v383_v48 = vadd.f32 %v382_v47, %v1374_v25  ;;  %948 = vmatprep.mubr.msk.f32.mxu1 %vm522_vm1, %v474_v43 }
 0x142   :  { %799 = vmatmul.mubr.f32.gmra.mrb[36].mxu1 %v473_v45  ;;  %v475_v51 = vmax.f32 %v381_v46, 0.0 }
 0x143   :  { %v476_v49 = vmax.f32 %v383_v48, 0.0  ;;  %v386_v50 = vpop.f32.mrb[50].mxu0 }
 0x144   :  { %v387_v52 = vadd.f32 %v386_v50, %v1372_v24  ;;  %v388_v53 = vpop.f32.mrb[51].mxu0 }
 0x145   :  { %v389_v54 = vadd.f32 %v388_v53, %v1374_v25  ;;  %949 = vmatprep.mubr.msk.f32.mxu1 %vm522_vm1, %v476_v49 }
 0x146   :  { %804 = vmatmul.mubr.f32.gmra.mrb[38].mxu1 %v475_v51  ;;  %v477_v57 = vmax.f32 %v387_v52, 0.0 }
 0x147   :  { %v478_v55 = vmax.f32 %v389_v54, 0.0  ;;  %v392_v56 = vpop.f32.mrb[52].mxu0 }
 0x148   :  { %v393_v58 = vadd.f32 %v392_v56, %v1372_v24  ;;  %v394_v59 = vpop.f32.mrb[53].mxu0 }
 0x149   :  { %v395_v60 = vadd.f32 %v394_v59, %v1374_v25  ;;  %950 = vmatprep.mubr.msk.f32.mxu1 %vm522_vm1, %v478_v55 }
 0x14a   :  { %809 = vmatmul.mubr.f32.gmra.mrb[40].mxu1 %v477_v57  ;;  %v479_v63 = vmax.f32 %v393_v58, 0.0 }
 0x14b   :  { %v480_v61 = vmax.f32 %v395_v60, 0.0  ;;  %v398_v62 = vpop.f32.mrb[54].mxu0 }
 0x14c   :  { %v399_v0 = vadd.f32 %v398_v62, %v1372_v24  ;;  %v400_v1 = vpop.f32.mrb[55].mxu0 }
 0x14d   :  { %v401_v2 = vadd.f32 %v400_v1, %v1374_v25  ;;  %951 = vmatprep.mubr.msk.f32.mxu1 %vm522_vm1, %v480_v61 }
 0x14e   :  { %814 = vmatmul.mubr.f32.gmra.mrb[42].mxu1 %v479_v63  ;;  %v481_v5 = vmax.f32 %v399_v0, 0.0 }
 0x14f   :  { %v482_v3 = vmax.f32 %v401_v2, 0.0  ;;  %v404_v4 = vpop.f32.mrb[56].mxu0 }
 0x150   :  { %v405_v6 = vadd.f32 %v404_v4, %v1372_v24  ;;  %v406_v8 = vpop.f32.mrb[57].mxu0 }
 0x151   :  { %v407_v9 = vadd.f32 %v406_v8, %v1374_v25  ;;  %952 = vmatprep.mubr.msk.f32.mxu1 %vm522_vm1, %v482_v3 }
 0x152   :  { %819 = vmatmul.mubr.f32.gmra.mrb[44].mxu1 %v481_v5  ;;  %v483_v12 = vmax.f32 %v405_v6, 0.0 }
 0x153   :  { %v484_v10 = vmax.f32 %v407_v9, 0.0  ;;  %v410_v11 = vpop.f32.mrb[58].mxu0 }
 0x154   :  { %v411_v13 = vadd.f32 %v410_v11, %v1372_v24  ;;  %v412_v14 = vpop.f32.mrb[59].mxu0 }
 0x155   :  { %v413_v15 = vadd.f32 %v412_v14, %v1374_v25  ;;  %953 = vmatprep.mubr.msk.f32.mxu1 %vm522_vm1, %v484_v10 }
 0x156   :  { %824 = vmatmul.mubr.f32.gmra.mrb[46].mxu1 %v483_v12  ;;  %v485_v18 = vmax.f32 %v411_v13, 0.0 }
 0x157   :  { %v486_v16 = vmax.f32 %v413_v15, 0.0  ;;  %v416_v17 = vpop.f32.mrb[60].mxu0 }
 0x158   :  { %v417_v19 = vadd.f32 %v416_v17, %v1372_v24  ;;  %v418_v20 = vpop.f32.mrb[61].mxu0 }
 0x159   :  { %v419_v21 = vadd.f32 %v418_v20, %v1374_v25  ;;  %954 = vmatprep.mubr.msk.f32.mxu1 %vm522_vm1, %v486_v16 }
 0x15a   :  { %829 = vmatmul.mubr.f32.gmra.mrb[48].mxu1 %v485_v18  ;;  %v487_v26 = vmax.f32 %v417_v19, 0.0 }
 0x15b   :  { %v488_v22 = vmax.f32 %v419_v21, 0.0  ;;  %v422_v23 = vpop.f32.mrb[62].mxu0 }
 0x15c   :  { %v423_v7 = vadd.f32 %v422_v23, %v1372_v24  ;;  %v424_v27 = vpop.f32.mrb[63].mxu0 }
 0x15d   :  { %v425_v28 = vadd.f32 %v424_v27, %v1374_v25  ;;  %955 = vmatprep.mubr.msk.f32.mxu1 %vm522_vm1, %v488_v22 }
 0x15e   :  { %834 = vmatmul.mubr.f32.gmra.mrb[50].mxu1 %v487_v26  ;;  %v489_v30 = vmax.f32 %v423_v7, 0.0 }
 0x15f   :  { %v490_v29 = vmax.f32 %v425_v28, 0.0 }
 0x161   :  { %956 = vmatprep.mubr.msk.f32.mxu1 %vm522_vm1, %v490_v29 }
 0x162   :  { %839 = vmatmul.mubr.f32.gmra.mrb[52].mxu1 %v489_v30 }
 0x1b9   :  { %v685_v32 = vpop.f32.mrb[64].mxu0 }
 0x1ba   :  { %v686_v33 = vadd.f32 %v1475_v31, %v685_v32  ;;  %v687_v24 = vpop.f32.mrb[65].mxu0 }
 0x1bc   :  { %844 = vst [vmem:[#allocation2] sm:$0xff] %v686_v33 }
 0x1bd   :  { %v690_v34 = vpop.f32.mrb[66].mxu0 }
 0x1be   :  { %v691_v25 = vadd.f32 %v1475_v31, %v690_v34  ;;  %v692_v35 = vpop.f32.mrb[67].mxu0 }
 0x1c0   :  { %845 = vst [vmem:[#allocation2 + $0x8] sm:$0xff] %v691_v25 }
 0x1c1   :  { %v695_v36 = vpop.f32.mrb[68].mxu0 }
 0x1c2   :  { %v696_v37 = vadd.f32 %v1475_v31, %v695_v36  ;;  %v697_v38 = vpop.f32.mrb[69].mxu0 }
 0x1c4   :  { %846 = vst [vmem:[#allocation2 + $0x10] sm:$0xff] %v696_v37 }
 0x1c5   :  { %v700_v39 = vpop.f32.mrb[70].mxu0 }
 0x1c6   :  { %v701_v40 = vadd.f32 %v1475_v31, %v700_v39  ;;  %v702_v41 = vpop.f32.mrb[71].mxu0 }
 0x1c8   :  { %847 = vst [vmem:[#allocation2 + $0x18] sm:$0xff] %v701_v40 }
 0x1c9   :  { %v705_v42 = vpop.f32.mrb[72].mxu0 }
 0x1ca   :  { %v706_v43 = vadd.f32 %v1475_v31, %v705_v42  ;;  %v707_v44 = vpop.f32.mrb[73].mxu0 }
 0x1cc   :  { %848 = vst [vmem:[#allocation2 + $0x20] sm:$0xff] %v706_v43 }
 0x1cd   :  { %v710_v45 = vpop.f32.mrb[0].mxu1 }
 0x1ce   :  { %v711_v46 = vadd.f32 %v1475_v31, %v710_v45  ;;  %v712_v47 = vpop.f32.mrb[1].mxu1 }
 0x1d0   :  { %849 = vst [vmem:[#allocation2 + $0x28] sm:$0xff] %v711_v46 }
 0x1d1   :  { %v715_v48 = vpop.f32.mrb[2].mxu1 }
 0x1d2   :  { %v716_v49 = vadd.f32 %v1475_v31, %v715_v48  ;;  %v717_v50 = vpop.f32.mrb[3].mxu1 }
 0x1d4   :  { %850 = vst [vmem:[#allocation2 + $0x30] sm:$0xff] %v716_v49 }
 0x1d5   :  { %v720_v51 = vpop.f32.mrb[4].mxu1 }
 0x1d6   :  { %v721_v52 = vadd.f32 %v1475_v31, %v720_v51  ;;  %v722_v53 = vpop.f32.mrb[5].mxu1 }
 0x1d8   :  { %851 = vst [vmem:[#allocation2 + $0x38] sm:$0xff] %v721_v52 }
 0x1d9   :  { %v725_v54 = vpop.f32.mrb[6].mxu1 }
 0x1da   :  { %v726_v55 = vadd.f32 %v1475_v31, %v725_v54  ;;  %v727_v56 = vpop.f32.mrb[7].mxu1 }
 0x1dc   :  { %852 = vst [vmem:[#allocation2 + $0x40] sm:$0xff] %v726_v55 }
 0x1dd   :  { %v730_v57 = vpop.f32.mrb[8].mxu1 }
 0x1de   :  { %v731_v58 = vadd.f32 %v1475_v31, %v730_v57  ;;  %v732_v59 = vpop.f32.mrb[9].mxu1 }
 0x1e0   :  { %853 = vst [vmem:[#allocation2 + $0x48] sm:$0xff] %v731_v58 }
 0x1e1   :  { %v735_v60 = vpop.f32.mrb[10].mxu1 }
 0x1e2   :  { %v736_v61 = vadd.f32 %v1475_v31, %v735_v60  ;;  %v737_v62 = vpop.f32.mrb[11].mxu1 }
 0x1e4   :  { %854 = vst [vmem:[#allocation2 + $0x50] sm:$0xff] %v736_v61 }
 0x1e5   :  { %v740_v63 = vpop.f32.mrb[12].mxu1 }
 0x1e6   :  { %v741_v0 = vadd.f32 %v1475_v31, %v740_v63  ;;  %v742_v1 = vpop.f32.mrb[13].mxu1 }
 0x1e8   :  { %855 = vst [vmem:[#allocation2 + $0x58] sm:$0xff] %v741_v0 }
 0x1e9   :  { %v745_v2 = vpop.f32.mrb[14].mxu1 }
 0x1ea   :  { %v746_v3 = vadd.f32 %v1475_v31, %v745_v2  ;;  %v747_v4 = vpop.f32.mrb[15].mxu1 }
 0x1ec   :  { %856 = vst [vmem:[#allocation2 + $0x60] sm:$0xff] %v746_v3 }
 0x1ed   :  { %v750_v5 = vpop.f32.mrb[16].mxu1 }
 0x1ee   :  { %v751_v6 = vadd.f32 %v1475_v31, %v750_v5  ;;  %v752_v8 = vpop.f32.mrb[17].mxu1 }
 0x1f0   :  { %857 = vst [vmem:[#allocation2 + $0x68] sm:$0xff] %v751_v6 }
 0x1f1   :  { %v755_v9 = vpop.f32.mrb[18].mxu1 }
 0x1f2   :  { %v756_v10 = vadd.f32 %v1475_v31, %v755_v9  ;;  %v757_v11 = vpop.f32.mrb[19].mxu1 }
 0x1f4   :  { %858 = vst [vmem:[#allocation2 + $0x70] sm:$0xff] %v756_v10 }
 0x1f5   :  { %v760_v12 = vpop.f32.mrb[20].mxu1 }
 0x1f6   :  { %v761_v13 = vadd.f32 %v1475_v31, %v760_v12  ;;  %v762_v14 = vpop.f32.mrb[21].mxu1 }
 0x1f8   :  { %859 = vst [vmem:[#allocation2 + $0x78] sm:$0xff] %v761_v13 }
 0x1f9   :  { %v765_v15 = vpop.f32.mrb[22].mxu1 }
 0x1fa   :  { %v766_v16 = vadd.f32 %v1475_v31, %v765_v15  ;;  %v767_v17 = vpop.f32.mrb[23].mxu1 }
 0x1fc   :  { %860 = vst [vmem:[#allocation2 + $0x80] sm:$0xff] %v766_v16 }
 0x1fd   :  { %v770_v18 = vpop.f32.mrb[24].mxu1 }
 0x1fe   :  { %v771_v19 = vadd.f32 %v1475_v31, %v770_v18  ;;  %v772_v20 = vpop.f32.mrb[25].mxu1 }
 0x200   :  { %861 = vst [vmem:[#allocation2 + $0x88] sm:$0xff] %v771_v19 }
 0x201   :  { %v775_v21 = vpop.f32.mrb[26].mxu1 }
 0x202   :  { %v776_v22 = vadd.f32 %v1475_v31, %v775_v21  ;;  %v777_v23 = vpop.f32.mrb[27].mxu1 }
 0x204   :  { %862 = vst [vmem:[#allocation2 + $0x90] sm:$0xff] %v776_v22 }
 0x205   :  { %v780_v26 = vpop.f32.mrb[28].mxu1 }
 0x206   :  { %v781_v7 = vadd.f32 %v1475_v31, %v780_v26  ;;  %v782_v27 = vpop.f32.mrb[29].mxu1 }
 0x208   :  { %863 = vst [vmem:[#allocation2 + $0x98] sm:$0xff] %v781_v7 }
 0x209   :  { %v785_v28 = vpop.f32.mrb[30].mxu1 }
 0x20a   :  { %v786_v29 = vadd.f32 %v1475_v31, %v785_v28  ;;  %v787_v30 = vpop.f32.mrb[31].mxu1 }
 0x20c   :  { %864 = vst [vmem:[#allocation2 + $0xa0] sm:$0xff] %v786_v29 }
 0x20d   :  { %v790_v32 = vpop.f32.mrb[32].mxu1 }
 0x20e   :  { %v791_v33 = vadd.f32 %v1475_v31, %v790_v32  ;;  %v792_v24 = vpop.f32.mrb[33].mxu1 }
 0x210   :  { %865 = vst [vmem:[#allocation2 + $0xa8] sm:$0xff] %v791_v33 }
 0x211   :  { %v795_v34 = vpop.f32.mrb[34].mxu1 }
 0x212   :  { %v796_v25 = vadd.f32 %v1475_v31, %v795_v34  ;;  %v797_v35 = vpop.f32.mrb[35].mxu1 }
 0x214   :  { %866 = vst [vmem:[#allocation2 + $0xb0] sm:$0xff] %v796_v25 }
 0x215   :  { %v800_v36 = vpop.f32.mrb[36].mxu1 }
 0x216   :  { %v801_v37 = vadd.f32 %v1475_v31, %v800_v36  ;;  %v802_v38 = vpop.f32.mrb[37].mxu1 }
 0x218   :  { %867 = vst [vmem:[#allocation2 + $0xb8] sm:$0xff] %v801_v37 }
 0x219   :  { %v805_v39 = vpop.f32.mrb[38].mxu1 }
 0x21a   :  { %v806_v40 = vadd.f32 %v1475_v31, %v805_v39  ;;  %v807_v41 = vpop.f32.mrb[39].mxu1 }
 0x21c   :  { %868 = vst [vmem:[#allocation2 + $0xc0] sm:$0xff] %v806_v40 }
 0x21d   :  { %v810_v42 = vpop.f32.mrb[40].mxu1 }
 0x21e   :  { %v811_v43 = vadd.f32 %v1475_v31, %v810_v42  ;;  %v812_v44 = vpop.f32.mrb[41].mxu1 }
 0x220   :  { %869 = vst [vmem:[#allocation2 + $0xc8] sm:$0xff] %v811_v43 }
 0x221   :  { %v815_v45 = vpop.f32.mrb[42].mxu1 }
 0x222   :  { %v816_v46 = vadd.f32 %v1475_v31, %v815_v45  ;;  %v817_v47 = vpop.f32.mrb[43].mxu1 }
 0x224   :  { %870 = vst [vmem:[#allocation2 + $0xd0] sm:$0xff] %v816_v46 }
 0x225   :  { %v820_v48 = vpop.f32.mrb[44].mxu1 }
 0x226   :  { %v821_v49 = vadd.f32 %v1475_v31, %v820_v48  ;;  %v822_v50 = vpop.f32.mrb[45].mxu1 }
 0x228   :  { %871 = vst [vmem:[#allocation2 + $0xd8] sm:$0xff] %v821_v49 }
 0x229   :  { %v825_v51 = vpop.f32.mrb[46].mxu1 }
 0x22a   :  { %v826_v52 = vadd.f32 %v1475_v31, %v825_v51  ;;  %v827_v53 = vpop.f32.mrb[47].mxu1 }
 0x22c   :  { %872 = vst [vmem:[#allocation2 + $0xe0] sm:$0xff] %v826_v52 }
 0x22d   :  { %v830_v54 = vpop.f32.mrb[48].mxu1 }
 0x22e   :  { %v831_v55 = vadd.f32 %v1475_v31, %v830_v54  ;;  %v832_v56 = vpop.f32.mrb[49].mxu1 }
 0x230   :  { %873 = vst [vmem:[#allocation2 + $0xe8] sm:$0xff] %v831_v55 }
 0x231   :  { %v835_v57 = vpop.f32.mrb[50].mxu1 }
 0x232   :  { %v836_v58 = vadd.f32 %v1475_v31, %v835_v57  ;;  %v837_v59 = vpop.f32.mrb[51].mxu1 }
 0x234   :  { %874 = vst [vmem:[#allocation2 + $0xf0] sm:$0xff] %v836_v58 }
 0x235   :  { %v840_v60 = vpop.f32.mrb[52].mxu1 }
 0x236   :  { %v841_v61 = vadd.f32 %v1475_v31, %v840_v60  ;;  %v842_v62 = vpop.f32.mrb[53].mxu1 }
 0x238   :  { %875 = vst [vmem:[#allocation2 + $0xf8] sm:$0xff] %v841_v61 }
 0x239   :  { %1041 = shalt.err (!%p1038_p4)
}
 0x23a   :  { %s1042_s21 = scalar_lea.hbm %s1526_s5, 4096 }
 0x23b   :  { %p1043_p5 = scmp.ne.s32.totalorder %s1526_s5, %s1042_s21  ;;  %p1046_p6 = scmp.lt.u32.totalorder %s1042_s21, %s1526_s5 }
 0x23d   :  { %p1048_p7 = pnand %p1046_p6, %p1043_p5 }
 0x23f   :  { %1051 = shalt.err (!%p1048_p7)
}
 0x240   :  { %s1057_s3 = smov 128   ;;  %s1058_s26 = smov 8  }
 0x241   :  { %887 = dma.vmem_to_hbm [thread:$0]  %s882_s17, 4096, %s1526_s5, [#allocation3], %s1057_s3, %s1057_s3, %s1058_s26  }
 0x242   :  { %1052 = dma.done.wait [#allocation3], 4096  }
 0x243   :  { %1053 = vsyncadd [#allocation3], 4294963200 }
 0x244   :  { %891 = vsyncpa [#allocation3], 1 }

</bundles_post_ra>
